<compile_context>
chip_gen: v6e
topology: v6e:2x2x1
jax: 0.10.0
libtpu: 0.0.40
codegen_flags: <defaults>
</compile_context>

<pallas_src>
import math

import jax
import jax.numpy as jnp
from jax.experimental import pallas as pl
from jax.experimental.pallas import tpu as pltpu


_BLOCK_BUDGET = 8 * 1024 * 1024          # ~8 MiB per output block
_DEFAULT_VMEM_CAP = 64 * 1024 * 1024     # conservative fallback (v7x per-TC VMEM)


def _pos_embed_kernel(pos_ref, o_ref):
    # pos_ref: positional-table tile, either (ts, D) or (1, ts*D)
    # o_ref:   output tile,           either (tb, ts, D) or (tb, ts*D)
    # Broadcast the table tile over the leading batch-tile axis.
    p = pos_ref[...].reshape((1,) + o_ref.shape[1:])
    o_ref[...] = jnp.broadcast_to(p, o_ref.shape)


def _vmem_capacity_bytes() -> int:
    """Per-TensorCore VMEM capacity; conservative fallback if unqueryable."""
    try:
        info = pltpu.get_tpu_info()
        for name in ("vmem_capacity_bytes", "vmem_bytes", "vmem_size_bytes"):
            v = getattr(info, name, None)
            if v:
                return int(v)
    except Exception:
        pass
    return _DEFAULT_VMEM_CAP


def _num_tensorcores() -> int:
    """TensorCores per chip (megacore); fall back to 1 (single-TC behaviour)."""
    try:
        info = pltpu.get_tpu_info()
        for name in ("num_cores", "core_count", "num_tensorcores", "tensorcore_count"):
            v = getattr(info, name, None)
            if v:
                return int(v)
    except Exception:
        pass
    try:
        v = getattr(jax.devices()[0], "num_cores", None)
        if v:
            return int(v)
    except Exception:
        pass
    return 1


def _round_down(x: int, m: int) -> int:
    return max(m, (x // m) * m)


def gpt2_positional_embed(pos_embed: jax.Array, input_ids: jax.Array) -> jax.Array:
    """Forward pass of GPT2PositionalEmbed.

    Args:
      pos_embed: (n_ctx, d_model) learned positional-embedding table.
      input_ids: (batch, seq_len) token ids (only their *shape* is used,
                 exactly as in the reference module).
    Returns:
      (batch, seq_len, d_model) array with pos_embed's dtype.
    """
    batch, seq_len = input_ids.shape
    n_ctx, d_model = pos_embed.shape
    assert seq_len <= n_ctx, "seq_len must not exceed n_ctx"

    pos = pos_embed[:seq_len]                      # (S, D); static slice, plain-JAX glue
    dtype = pos.dtype
    itemsize = jnp.dtype(dtype).itemsize
    row_bytes = d_model * itemsize

    # --- generation-aware VMEM budget --------------------------------------
    vmem_cap = _vmem_capacity_bytes()
    vmem_limit = int(min(48 * 1024 * 1024, (vmem_cap * 3) // 4))
    num_cores = _num_tensorcores()

    flatten = (d_model % 128) != 0
    if flatten:
        # Path B: lane-dense flattened output. ts*d_model must be a multiple
        # of 128 lanes (or the full extent); the batch tile becomes the
        # sublane dim, so it must be a multiple of 8 or the full batch.
        seq_mult = 128 // math.gcd(d_model, 128)
        tb_min = batch if batch < 8 else 8
    else:
        # Path A: D stays the (lane-dense) minor dim; the sequence tile obeys
        # the dtype-aware sublane packing multiple.
        seq_mult = {4: 8, 2: 16, 1: 32}.get(itemsize, 8)
        tb_min = 1

    # --- sequence tile (budgeted for the smallest legal batch tile) --------
    if seq_len * tb_min * row_bytes <= _BLOCK_BUDGET:
        ts = seq_len                               # full extent: always a legal block dim
    else:
        cap = max(seq_mult, _BLOCK_BUDGET // (tb_min * row_bytes))
        ts = _round_down(min(cap, seq_len), seq_mult)

    # --- batch tile: grow within the budget ---------------------------------
    tb_cap = max(tb_min, _BLOCK_BUDGET // (ts * row_bytes))
    if batch <= tb_cap:
        tb = batch
    elif flatten:
        tb = max(tb_min, (tb_cap // 8) * 8)
    else:
        tb = tb_cap

    # --- megacore: ensure >= num_cores blocks, only on multi-TC chips -------
    if num_cores >= 2 and pl.cdiv(seq_len, ts) * pl.cdiv(batch, tb) < num_cores:
        tb_split = pl.cdiv(batch, num_cores)
        if batch > 1 and (not flatten or tb_split % 8 == 0 or tb_split == batch):
            tb = tb_split                          # num_cores contiguous batch chunks
        else:
            ts_split = _round_down(pl.cdiv(ts, num_cores), seq_mult)
            if seq_mult <= ts_split < ts:
                ts = ts_split

    # Sequence axis outer, batch axis inner: the pos-table block index is
    # constant across the inner axis, so each table tile is DMA'd only once.
    grid = (pl.cdiv(seq_len, ts), pl.cdiv(batch, tb))

    if flatten:
        pos_in = pos.reshape(1, seq_len * d_model)
        in_spec = pl.BlockSpec((1, ts * d_model), lambda s, b: (0, s))
        out_spec = pl.BlockSpec((tb, ts * d_model), lambda s, b: (b, s))
        out_shape = jax.ShapeDtypeStruct((batch, seq_len * d_model), dtype)
    else:
        pos_in = pos
        in_spec = pl.BlockSpec((ts, d_model), lambda s, b: (s, 0))
        out_spec = pl.BlockSpec((tb, ts, d_model), lambda s, b: (b, s, 0))
        out_shape = jax.ShapeDtypeStruct((batch, seq_len, d_model), dtype)

    out = pl.pallas_call(
        _pos_embed_kernel,
        out_shape=out_shape,
        grid_spec=pltpu.PrefetchScalarGridSpec(
            num_scalar_prefetch=0,
            grid=grid,
            in_specs=[in_spec],
            out_specs=out_spec,
        ),
        compiler_params=pltpu.CompilerParams(
            dimension_semantics=("parallel", "parallel"),
            vmem_limit_bytes=vmem_limit,
        ),
    )(pos_in)

    if flatten:
        out = out.reshape(batch, seq_len, d_model)
    return out


if __name__ == "__main__":
    key = jax.random.PRNGKey(0)
    k_pos, k_ids, k_pos2 = jax.random.split(key, 3)

    # Primary small-shape test consistent with the module:
    # n_ctx=16, d_model=32, batch=2, seq=8 (exercises the lane-dense flattened path).
    batch, seq_len, n_ctx, d_model = 2, 8, 16, 32
    init_range = 0.02
    pos_embed = init_range * jax.random.normal(
        k_pos, (n_ctx, d_model), dtype=jnp.float32
    )
    input_ids = jax.random.randint(
        k_ids, (batch, seq_len), 0, 50257, dtype=jnp.int32
    )

    out = jax.block_until_ready(gpt2_positional_embed(pos_embed, input_ids))
    ref = jnp.broadcast_to(
        pos_embed[:seq_len][None, :, :], (batch, seq_len, d_model)
    )
    assert out.shape == (batch, seq_len, d_model)
    assert out.dtype == pos_embed.dtype
    assert jnp.array_equal(out, ref), "mismatch vs reference (flattened path)"

    # Secondary check exercising the 3-D (lane-aligned d_model) path.
    b2, s2, c2, d2 = 2, 16, 32, 128
    pos_embed2 = init_range * jax.random.normal(k_pos2, (c2, d2), dtype=jnp.float32)
    input_ids2 = jnp.zeros((b2, s2), dtype=jnp.int32)
    out2 = jax.block_until_ready(gpt2_positional_embed(pos_embed2, input_ids2))
    ref2 = jnp.broadcast_to(pos_embed2[:s2][None, :, :], (b2, s2, d2))
    assert jnp.array_equal(out2, ref2), "mismatch vs reference (3-D path)"

    print("KERNEL_OK")
</pallas_src>

<mosaic_0001>
module attributes {stable_mosaic.version = 11 : i64} {
  func.func @_pos_embed_kernel(%arg0: i32, %arg1: i32, %arg2: memref<1x256xf32, #tpu.memory_space<vmem>>, %arg3: memref<2x256xf32, #tpu.memory_space<vmem>>) attributes {dimension_semantics = [#tpu.dimension_semantics<parallel>, #tpu.dimension_semantics<parallel>], iteration_bounds = array<i64: 1, 1>, scalar_prefetch = 0 : i64, scratch_operands = 0 : i64, tpu.core_type = #tpu.core_type<tc>, window_params = [{transform_indices = @transform_0, window_bounds = array<i64: 1, 256>}, {transform_indices = @transform_1, window_bounds = array<i64: 2, 256>}]} {
    %c0 = arith.constant 0 : index
    %c0_0 = arith.constant 0 : index
    %0 = vector.load %arg2[%c0, %c0_0] : memref<1x256xf32, #tpu.memory_space<vmem>>, vector<1x256xf32>
    %1 = vector.shape_cast %0 : vector<1x256xf32> to vector<1x256xf32>
    %2 = vector.broadcast %1 : vector<1x256xf32> to vector<2x256xf32>
    %c0_1 = arith.constant 0 : index
    %c0_2 = arith.constant 0 : index
    %3 = vector.load %arg3[%c0_1, %c0_2] : memref<2x256xf32, #tpu.memory_space<vmem>>, vector<2x256xf32>
    tpu.vector_store %arg3[%c0_1, %c0_2], %2 {strides = array<i32>} : memref<2x256xf32, #tpu.memory_space<vmem>>, vector<2x256xf32>,
    return
  }
  func.func @transform_0(%arg0: i32, %arg1: i32) -> (i32, i32) {
    %c0_i32 = arith.constant 0 : i32
    %c0_i32_0 = arith.constant 0 : i32
    return %c0_i32, %arg0 : i32, i32
  }
  func.func @transform_1(%arg0: i32, %arg1: i32) -> (i32, i32) {
    %c0_i32 = arith.constant 0 : i32
    return %arg1, %arg0 : i32, i32
  }
}

</mosaic_0001>

<bundles_post_ra>
// kernel: tpu_custom_call.1
= control target key start
LH: loop header
LB: loop body
LE: loop exit
PB: predicated region body
PF: predicated region fallthrough
CT: control target
= control target key end

     0   :  { %6 = vsyncpa [#allocation3], 0  ;;  %s121_s0 = inlined_call_operand.hbm [shape: f32[1,256], index: 0, kind: input, shape index: {}]   ;;  %s122_s1 = inlined_call_operand.hbm [shape: f32[2,256], index: 1, kind: output, shape index: {}]  }
   0x1   :  { %7 = vsyncpa [#allocation4], 0  ;;  %s103_s6 = smov [#allocation2]  }
   0x2   :  { %s14_s7 = sshll.u32 %s103_s6, 4  ;;  %s15_s7 = int_to_ptr.vmem [resolvable:$true] %s14_s7 }
   0x3   :  { %s67_s8 = scalar_lea.vmem %s15_s7, 32  ;;  %p72_p1 = scmp.lt.s32.totalorder %s15_s7, %s15_s7 }
   0x4   :  { %p68_p0 = scmp.ne.s32.totalorder %s15_s7, %s67_s8  ;;  %p73_p2 = scmp.lt.s32.totalorder %s67_s8, %s67_s8 }
   0x6   :  { %p74_p3 = por %p73_p2, %p72_p1 }
   0x8   :  { %p75_p4 = pnand %p74_p3, %p68_p0 }
   0xa   :  { %78 = shalt.err (!%p75_p4)
}
   0xb   :  { %17 = dma.hbm_to_vmem [thread:$0]  %s121_s0, 32, %s15_s7, [#allocation3]  }
   0xc   :  { %99 = dma.done.wait [#allocation3], 32  }
   0xd   :  { %100 = vsyncadd [#allocation3], 4294967264  ;;  %v23_v0 = vlaneseq  ;;  %v21_v4 = vld [vmem:[#allocation2] sm:$0x3]  ;;  %s104_s11 = smov [#allocation5]  }
   0xe   :  { %s47_s12 = sshll.u32 %s104_s11, 4  ;;  %s48_s12 = int_to_ptr.vmem [resolvable:$true] %s47_s12 }
   0xf   :  { %v24_v1 = vshrl.u32 %v23_v0, 7  ;;  %s79_s13 = scalar_lea.vmem %s48_s12, 64  ;;  %p84_p6 = scmp.lt.s32.totalorder %s48_s12, %s48_s12 }
  0x10   :  { %p80_p5 = scmp.ne.s32.totalorder %s48_s12, %s79_s13  ;;  %p85_p7 = scmp.lt.s32.totalorder %s79_s13, %s79_s13 }
  0x11   :  { %v25_v2 = vsub.s32 0, %v24_v1  ;;  %v29_v3 = vsub.s32 1, %v24_v1 }
  0x12   :  { %p86_p8 = por %p85_p7, %p84_p6 }
  0x13   :  { %v26_v5 = vrot.slane %v21_v4, %v25_v2  ;;  %v30_v6 = vrot.slane %v21_v4, %v29_v3 }
  0x14   :  { %p87_p9 = pnand %p86_p8, %p80_p5 }
  0x15   :  { %v31_v7 = vcombine.low %v26_v5, %v30_v6 }
  0x17   :  { %56 = vst.sshfl [vmem:[#allocation5] sm:$0x33 pattern:$0x76325410] %v31_v7 }
  0x18   :  { %90 = shalt.err (!%p87_p9)
}
  0x19   :  { %50 = dma.vmem_to_hbm [thread:$0]  %s48_s12, 64, %s122_s1, [#allocation4]  }
  0x1a   :  { %101 = dma.done.wait [#allocation4], 64  }
  0x1b   :  { %102 = vsyncadd [#allocation4], 4294967232 }
  0x1c   :  { %54 = vsyncpa [#allocation3], 1 }
  0x1d   :  { %55 = vsyncpa [#allocation4], 1 }

</bundles_post_ra>
